<compile_context>
chip_gen: v7x
topology: tpu7x:2x2x1
jax: 0.10.0
libtpu: 0.0.40
codegen_flags: <defaults>
</compile_context>

<pallas_src>
import jax
import jax.numpy as jnp
from jax.experimental import pallas as pl
from jax.experimental.pallas import tpu as pltpu

DIM = 300
HIDDEN = 10


def _round_up(n, m):
    return ((n + m - 1) // m) * m


def _mlp_kernel(x_ref, w1_ref, b1_ref, w2_ref, b2_ref, o_ref):
    # Layer 1 on the MXU: (TB, DIM) @ (DIM, HIDDEN), f32 accumulation.
    h = jnp.dot(x_ref[...], w1_ref[...], preferred_element_type=jnp.float32)
    # Move batch to the lane axis: (TB, HIDDEN) -> (HIDDEN, TB).  XLU transpose;
    # everything downstream is lane-dense and uses ~8x fewer vregs.
    ht = jnp.transpose(h)
    ht = jnp.maximum(ht + b1_ref[...], 0.0)                 # bias (H,1) + ReLU
    # Layer 2 as VPU multiply + sublane reduce (avoids a padded N=1 MXU matmul).
    z = jnp.sum(ht * w2_ref[...], axis=0, keepdims=True) + b2_ref[...]  # (1, TB)
    # Sigmoid: exp and approximate reciprocal both issue to the (idle) EUP slot.
    o_ref[...] = pl.reciprocal(1.0 + jnp.exp(-z), approx=True)


def myfcnn_forward(x, w1, b1, w2, b2, *, tb=1024):
    """x: (B, DIM) f32; w1: (DIM, H); b1: (H, 1); w2: (H, 1); b2: (1, 1).

    Computes sigmoid(relu(x @ w1 + b1.T) @ w2 + b2) with size-1 dims squeezed,
    i.e. shape (B,) (0-d if B == 1), matching torch.squeeze.
    """
    B = x.shape[0]
    # Tile size: multiple of 128 (lane-dense output store; also satisfies the
    # sublane-8 rule on the (tb, DIM) x block). Cap for tiny batches.
    tb = min(_round_up(max(tb, 128), 128), _round_up(B, 128))
    b_pad = _round_up(B, tb)
    num_tiles = b_pad // tb
    if b_pad != B:
        x = jnp.pad(x, ((0, b_pad - B), (0, 0)))

    out = pl.pallas_call(
        _mlp_kernel,
        out_shape=jax.ShapeDtypeStruct((num_tiles, 1, tb), jnp.float32),
        grid=(num_tiles,),
        in_specs=[
            pl.BlockSpec((tb, DIM), lambda i: (i, 0)),      # x streams per tile
            pl.BlockSpec((DIM, HIDDEN), lambda i: (0, 0)),  # weights stay resident
            pl.BlockSpec((HIDDEN, 1), lambda i: (0, 0)),
            pl.BlockSpec((HIDDEN, 1), lambda i: (0, 0)),
            pl.BlockSpec((1, 1), lambda i: (0, 0)),
        ],
        # Leading dim squeezed: kernel sees a lane-dense (1, tb) output row.
        out_specs=pl.BlockSpec((None, 1, tb), lambda i: (i, 0, 0)),
        compiler_params=pltpu.CompilerParams(
            dimension_semantics=("parallel",),      # megacore sharding on v7x
            vmem_limit_bytes=32 * 1024 * 1024,      # safe on v5e / v6e / v7x
        ),
    )(x, w1, b1, w2, b2)

    # (num_tiles, 1, tb) -> (b_pad,) -> drop padding -> squeeze (torch.squeeze).
    return jnp.squeeze(out.reshape(-1)[:B])


def init_params(key):
    """Synthetic init mimicking nn.Linear's U(-1/sqrt(fan_in), +1/sqrt(fan_in)).

    Layouts vs. PyTorch: w1 = W1.T stored as (DIM, H); b1 and w2 stored as
    (H, 1) columns; b2 as (1, 1).  Mathematically identical forward pass.
    """
    k1, k2, k3, k4 = jax.random.split(key, 4)
    bound1 = 1.0 / jnp.sqrt(DIM)
    bound2 = 1.0 / jnp.sqrt(HIDDEN)
    w1 = jax.random.uniform(k1, (DIM, HIDDEN), jnp.float32, -bound1, bound1)
    b1 = jax.random.uniform(k2, (HIDDEN, 1), jnp.float32, -bound1, bound1)
    w2 = jax.random.uniform(k3, (HIDDEN, 1), jnp.float32, -bound2, bound2)
    b2 = jax.random.uniform(k4, (1, 1), jnp.float32, -bound2, bound2)
    return w1, b1, w2, b2


if __name__ == "__main__":
    key = jax.random.PRNGKey(0)
    kx, kx2, kp = jax.random.split(key, 3)

    w1, b1, w2, b2 = init_params(kp)

    def ref_forward(xx):
        h = jnp.maximum(xx @ w1 + b1.T, 0.0)
        return jax.nn.sigmoid(h @ w2 + b2).reshape(-1)

    # Multi-tile path: B not a multiple of the tile -> padded to 256, grid of 2.
    B = 200
    x = jax.random.normal(kx, (B, DIM), dtype=jnp.float32)
    probs = myfcnn_forward(x, w1, b1, w2, b2, tb=128)
    jax.block_until_ready(probs)
    assert probs.shape == (B,)
    # approx reciprocal in the sigmoid -> slightly loosened tolerance
    assert jnp.allclose(probs, ref_forward(x), atol=5e-3, rtol=0.0)

    # Default (large-tile) path on a tiny batch (single grid step, padded to 128).
    B2 = 8
    x2 = jax.random.normal(kx2, (B2, DIM), dtype=jnp.float32)
    probs2 = myfcnn_forward(x2, w1, b1, w2, b2)
    jax.block_until_ready(probs2)
    assert probs2.shape == (B2,)
    assert jnp.allclose(probs2, ref_forward(x2), atol=5e-3, rtol=0.0)

    print("KERNEL_OK")
</pallas_src>

<mosaic_0001>
module attributes {stable_mosaic.version = 11 : i64} {
  func.func @_mlp_kernel(%arg0: i32, %arg1: memref<128x300xf32, #tpu.memory_space<vmem>>, %arg2: memref<300x10xf32, #tpu.memory_space<vmem>>, %arg3: memref<10x1xf32, #tpu.memory_space<vmem>>, %arg4: memref<10x1xf32, #tpu.memory_space<vmem>>, %arg5: memref<1x1xf32, #tpu.memory_space<vmem>>, %arg6: memref<1x1x128xf32, #tpu.memory_space<vmem>>) attributes {dimension_semantics = [#tpu.dimension_semantics<parallel>], iteration_bounds = array<i64: 2>, scalar_prefetch = 0 : i64, scratch_operands = 0 : i64, tpu.core_type = #tpu.core_type<tc>, window_params = [{transform_indices = @transform_0, window_bounds = array<i64: 128, 300>}, {pipeline_mode = #tpu.pipeline_mode<synchronous>, transform_indices = @transform_1, window_bounds = array<i64: 300, 10>}, {pipeline_mode = #tpu.pipeline_mode<synchronous>, transform_indices = @transform_2, window_bounds = array<i64: 10, 1>}, {pipeline_mode = #tpu.pipeline_mode<synchronous>, transform_indices = @transform_3, window_bounds = array<i64: 10, 1>}, {pipeline_mode = #tpu.pipeline_mode<synchronous>, transform_indices = @transform_4, window_bounds = array<i64: 1, 1>}, {transform_indices = @transform_5, window_bounds = array<i64: 1, 1, 128>}]} {
    %c0 = arith.constant 0 : index
    %c0_0 = arith.constant 0 : index
    %0 = vector.load %arg1[%c0, %c0_0] : memref<128x300xf32, #tpu.memory_space<vmem>>, vector<128x300xf32>
    %c0_1 = arith.constant 0 : index
    %c0_2 = arith.constant 0 : index
    %1 = vector.load %arg2[%c0_1, %c0_2] : memref<300x10xf32, #tpu.memory_space<vmem>>, vector<300x10xf32>
    %cst = arith.constant dense<0.000000e+00> : vector<128x10xf32>
    %2 = tpu.matmul %0, %1, %cst {dimension_numbers = #tpu.dot_dimension_numbers<[1], [0], [0], [1], [0, 0, 1, 1], [], []>} : vector<128x300xf32>, vector<300x10xf32>, vector<128x10xf32> -> vector<128x10xf32>
    %3 = tpu.transpose %2, [1, 0] : vector<128x10xf32> -> vector<10x128xf32>
    %c0_3 = arith.constant 0 : index
    %c0_4 = arith.constant 0 : index
    %4 = vector.load %arg3[%c0_3, %c0_4] : memref<10x1xf32, #tpu.memory_space<vmem>>, vector<10x1xf32>
    %5 = vector.broadcast %4 : vector<10x1xf32> to vector<10x128xf32>
    %6 = arith.addf %3, %5 : vector<10x128xf32>
    %cst_5 = arith.constant 0.000000e+00 : f32
    %7 = vector.broadcast %cst_5 : f32 to vector<10x128xf32>
    %8 = arith.maximumf %6, %7 : vector<10x128xf32>
    %c0_6 = arith.constant 0 : index
    %c0_7 = arith.constant 0 : index
    %9 = vector.load %arg4[%c0_6, %c0_7] : memref<10x1xf32, #tpu.memory_space<vmem>>, vector<10x1xf32>
    %10 = vector.broadcast %9 : vector<10x1xf32> to vector<10x128xf32>
    %11 = arith.mulf %8, %10 : vector<10x128xf32>
    %cst_8 = arith.constant dense<0.000000e+00> : vector<128xf32>
    %12 = vector.multi_reduction <add>, %11, %cst_8 [0] : vector<10x128xf32> to vector<128xf32>
    %13 = vector.shape_cast %12 : vector<128xf32> to vector<1x128xf32>
    %c0_9 = arith.constant 0 : index
    %c0_10 = arith.constant 0 : index
    %14 = vector.load %arg5[%c0_9, %c0_10] : memref<1x1xf32, #tpu.memory_space<vmem>>, vector<1x1xf32>
    %15 = vector.broadcast %14 : vector<1x1xf32> to vector<1x128xf32>
    %16 = arith.addf %13, %15 : vector<1x128xf32>
    %cst_11 = arith.constant 0.000000e+00 : f32
    %17 = vector.broadcast %cst_11 : f32 to vector<1x128xf32>
    %18 = arith.subf %17, %16 : vector<1x128xf32>
    %19 = math.exp %18 : vector<1x128xf32>
    %cst_12 = arith.constant 1.000000e+00 : f32
    %20 = vector.broadcast %cst_12 : f32 to vector<1x128xf32>
    %21 = arith.addf %20, %19 : vector<1x128xf32>
    %22 = tpu.reciprocal %21 {approx = true} : vector<1x128xf32> -> vector<1x128xf32>
    %c0_13 = arith.constant 0 : index
    %c0_14 = arith.constant 0 : index
    %c0_15 = arith.constant 0 : index
    %23 = vector.load %arg6[%c0_13, %c0_14, %c0_15] : memref<1x1x128xf32, #tpu.memory_space<vmem>>, vector<1x1x128xf32>
    %24 = vector.shape_cast %23 : vector<1x1x128xf32> to vector<1x128xf32>
    %25 = vector.shape_cast %22 : vector<1x128xf32> to vector<1x1x128xf32>
    tpu.vector_store %arg6[%c0_13, %c0_14, %c0_15], %25 {strides = array<i32>} : memref<1x1x128xf32, #tpu.memory_space<vmem>>, vector<1x1x128xf32>,
    return
  }
  func.func @transform_0(%arg0: i32) -> (i32, i32) {
    %c0_i32 = arith.constant 0 : i32
    %c0_i32_0 = arith.constant 0 : i32
    return %arg0, %c0_i32 : i32, i32
  }
  func.func @transform_1(%arg0: i32) -> (i32, i32) {
    %c0_i32 = arith.constant 0 : i32
    %c0_i32_0 = arith.constant 0 : i32
    %c0_i32_1 = arith.constant 0 : i32
    return %c0_i32, %c0_i32_0 : i32, i32
  }
  func.func @transform_2(%arg0: i32) -> (i32, i32) {
    %c0_i32 = arith.constant 0 : i32
    %c0_i32_0 = arith.constant 0 : i32
    %c0_i32_1 = arith.constant 0 : i32
    return %c0_i32, %c0_i32_0 : i32, i32
  }
  func.func @transform_3(%arg0: i32) -> (i32, i32) {
    %c0_i32 = arith.constant 0 : i32
    %c0_i32_0 = arith.constant 0 : i32
    %c0_i32_1 = arith.constant 0 : i32
    return %c0_i32, %c0_i32_0 : i32, i32
  }
  func.func @transform_4(%arg0: i32) -> (i32, i32) {
    %c0_i32 = arith.constant 0 : i32
    %c0_i32_0 = arith.constant 0 : i32
    %c0_i32_1 = arith.constant 0 : i32
    return %c0_i32, %c0_i32_0 : i32, i32
  }
  func.func @transform_5(%arg0: i32) -> (i32, i32, i32) {
    %c0_i32 = arith.constant 0 : i32
    %c0_i32_0 = arith.constant 0 : i32
    %c0_i32_1 = arith.constant 0 : i32
    return %arg0, %c0_i32, %c0_i32_0 : i32, i32, i32
  }
}

</mosaic_0001>

<bundles_post_ra>
// kernel: tpu_custom_call.1
= control target key start
LH: loop header
LB: loop body
LE: loop exit
PB: predicated region body
PF: predicated region fallthrough
CT: control target
= control target key end

     0   :  { %s1493_s0 = inlined_call_operand.vmem [shape: f32[256,300], index: 0, kind: input, shape index: {}]   ;;  %s1494_s1 = inlined_call_operand.vmem [shape: f32[300,10], index: 1, kind: input, shape index: {}]   ;;  %s1495_s2 = inlined_call_operand.vmem [shape: f32[10,1], index: 2, kind: input, shape index: {}]   ;;  %s1496_s3 = inlined_call_operand.vmem [shape: f32[10,1], index: 3, kind: input, shape index: {}]   ;;  %s1497_s4 = inlined_call_operand.<no memory space> [shape: f32[1,1], index: 4, kind: input, shape index: {}]   ;;  %s1498_s5 = inlined_call_operand.hbm [shape: f32[2,1,128], index: 5, kind: output, shape index: {}]  }
   0x1   :  { %v10_v0 = vstv %s1497_s4 }
   0x2   :  { %11 = vst [vmem:[#allocation2] sm:$0x1] %v10_v0 }
   0x3   :  { %12 = vsyncpa [#allocation4], 0 }
   0x4   :  { %14 = vsyncpa [#allocation4 + $0x1], 0  ;;  %s1188_s20 = smov 0   ;;  %s1190_s21 = smov 0  }
   0x5   :  { %s1192_s22 = smov 0   ;;  %s1194_s23 = smov 0  }
   0x6 LB: > { %s813_s4 = sadd.s32 4294967295, %s1150_s23   ;;  %s814_s24 = sadd.s32 4294967294, %s1150_s23   ;;  %s1150_s23 = sphi %s1194_s23, %s1506_s23   ;;  %s1146_s22 = sphi %s1192_s22, %s1505_s22   ;;  %s1142_s21 = sphi %s1190_s21, %s1504_s21   ;;  %s1138_s20 = sphi %s1188_s20, %s1503_s20  }
   0x7   : > { %s1211_s25 = sadd.s32 1, %s1150_s23   ;;  %s137_s26 = sadd.s32 1, %s1146_s22 }
   0x8   : > { %s134_s27 = ssub.s32 %s1150_s23, %s1211_s25  ;;  %p147_p0 = scmp.ne.s32.totalorder %s1146_s22, %s1142_s21 }
   0x9   : > { %p135_p1 = scmp.eq.s32.totalorder %s134_s27, 0  ;;  %p148_p2 = scmp.eq.s32.totalorder %s813_s4, 1 }
   0xa   : > { %p153_p3 = scmp.ne.s32.totalorder %s1142_s21, %s1138_s20  ;;  %p154_p4 = scmp.eq.s32.totalorder %s814_s24, 1 }
   0xb   : > { %s1221_s28 = scalar_select %p135_p1, %s1146_s22, %s137_s26  }
   0xc   : > { %p1223_p5 = por %p148_p2, %p147_p0  ;;  %p1227_p6 = por %p154_p4, %p153_p3 }
   0xd   : > { %p817_p7 = scmp.ge.s32.totalorder %s1150_s23, 1  ;;  %p194_p8 = scmp.lt.s32.totalorder %s1150_s23, 3 }
   0xf   : > { %p195_p9 = pnand %p817_p7, %p194_p8 }
  0x10   : > { %v293_v1 = vld [vmem:[%s1494_s1 + $0x80] sm:$0xff] (!%p195_p9)  ;;  %v294_v2 = vld [vmem:[%s1494_s1 + $0x88] sm:$0xff] (!%p195_p9)  ;;  %s1242_s12 = sshll.u32 (!%p195_p9), %s813_s4, 4  ;;  %v295_v6 = vld [vmem:[%s1494_s1 + $0x90] sm:$0xff] (!%p195_p9)  ;;  %v1152_v13 = vmov (!%p195_p9), 0   ;;  %vm364_vm0 = vcmask (!%p195_p9), 1043456  }
  0x11   : > { %198 = sbr.rel (%p195_p9) target bundleno = 480 (0x1e0), region = 40  ;;  %v277_v3 = vld [vmem:[%s1494_s1] sm:$0xff] (!%p195_p9)  ;;  %v978_v4 = vpack.c.bf16 (!%p195_p9), %v294_v2, %v293_v1  ;;  %v278_v5 = vld [vmem:[%s1494_s1 + $0x8] sm:$0xff] (!%p195_p9)  ;;  %v296_v7 = vld [vmem:[%s1494_s1 + $0x98] sm:$0xff] (!%p195_p9)  ;;  %p223_p10 = scmp.lt.s32.totalorder (!%p195_p9), %s1242_s12, 31  ;;  %1083 = vset.pattern.permute.xlu1 (!%p195_p9), %v1152_v13  ;;  %1082 = vset.pattern.permute.xlu0 (!%p195_p9), %v1152_v13  ;;  %vm1153_vm1 = vmmov (!%p195_p9), 1  }
  0x12   : > { %v980_v8 = vpack.c.bf16 (!%p195_p9), %v278_v5, %v277_v3  ;;  %v982_v9 = vpack.c.bf16 (!%p195_p9), %v296_v7, %v295_v6  ;;  %v279_v10 = vld [vmem:[%s1494_s1 + $0x10] sm:$0xff] (!%p195_p9)  ;;  %v280_v11 = vld [vmem:[%s1494_s1 + $0x18] sm:$0xff] (!%p195_p9)  ;;  %v297_v12 = vld [vmem:[%s1494_s1 + $0xa0] sm:$0xff] (!%p195_p9)  ;;  %vm315_vm3 = vcmask (!%p195_p9), 359424   ;;  %vm720_vm4 = vcmask (!%p195_p9), 1041408   ;;  %s1451_s18 = scalar_lea.hbm (!%p195_p9), %s1498_s5, %s1242_s12  ;;  %s1154_s24 = smov (!%p195_p9), [#allocation3]  }
  0x13   : > { %1024 = vmatprep.subr.bf16.mxu1 (!%p195_p9), %v978_v4  ;;  %v298_v14 = vld [vmem:[%s1494_s1 + $0xa8] sm:$0xff] (!%p195_p9)  ;;  %979 = vmatprep.subr.bf16.mxu0 (!%p195_p9), %v978_v4  ;;  %v984_v15 = vpack.c.bf16 (!%p195_p9), %v280_v11, %v279_v10  ;;  %v281_v17 = vld [vmem:[%s1494_s1 + $0x20] sm:$0xff] (!%p195_p9)  ;;  %v299_v19 = vld [vmem:[%s1494_s1 + $0xb0] sm:$0xff] (!%p195_p9)  ;;  %s1092_s27 = sshll.u32 (!%p195_p9), %s1154_s24, 4  ;;  %s1093_s27 = int_to_ptr.vmem [resolvable:$false] %s1092_s27 }
  0x14   : > { %1032 = vmatpush3.bf16.msra.mxu1 (!%p195_p9), %v980_v8  ;;  %981 = vmatpush3.bf16.msra.mxu0 (!%p195_p9), %v980_v8  ;;  %v986_v16 = vpack.c.bf16 (!%p195_p9), %v298_v14, %v297_v12  ;;  %v282_v18 = vld [vmem:[%s1494_s1 + $0x28] sm:$0xff] (!%p195_p9)  ;;  %v300_v20 = vld [vmem:[%s1494_s1 + $0xb8] sm:$0xff] (!%p195_p9)  ;;  %v283_v23 = vld [vmem:[%s1494_s1 + $0x30] sm:$0xff] (!%p195_p9)  ;;  %s1094_s6 = scalar_lea.vmem (!%p195_p9), %s1093_s27, 32 }
  0x15   : > { %1025 = vmatprep.subr.bf16.mxu1 (!%p195_p9), %v982_v9  ;;  %983 = vmatprep.subr.bf16.mxu0 (!%p195_p9), %v982_v9  ;;  %v988_v21 = vpack.c.bf16 (!%p195_p9), %v282_v18, %v281_v17  ;;  %v990_v22 = vpack.c.bf16 (!%p195_p9), %v300_v20, %v299_v19  ;;  %v284_v24 = vld [vmem:[%s1494_s1 + $0x38] sm:$0xff] (!%p195_p9)  ;;  %v301_v25 = vld [vmem:[%s1494_s1 + $0xc0] sm:$0xff] (!%p195_p9)  ;;  %v302_v26 = vld [vmem:[%s1494_s1 + $0xc8] sm:$0xff] (!%p195_p9) }
  0x16   : > { %v992_v28 = vpack.c.bf16 (!%p195_p9), %v284_v24, %v283_v23  ;;  %v994_v29 = vpack.c.bf16 (!%p195_p9), %v302_v26, %v301_v25  ;;  %v285_v30 = vld [vmem:[%s1494_s1 + $0x40] sm:$0xff] (!%p195_p9)  ;;  %v286_v31 = vld [vmem:[%s1494_s1 + $0x48] sm:$0xff] (!%p195_p9)  ;;  %v303_v32 = vld [vmem:[%s1494_s1 + $0xd0] sm:$0xff] (!%p195_p9) }
  0x17   : > { %v304_v33 = vld [vmem:[%s1494_s1 + $0xd8] sm:$0xff] (!%p195_p9)  ;;  %v996_v35 = vpack.c.bf16 (!%p195_p9), %v286_v31, %v285_v30  ;;  %v287_v37 = vld [vmem:[%s1494_s1 + $0x50] sm:$0xff] (!%p195_p9)  ;;  %v305_v39 = vld [vmem:[%s1494_s1 + $0xe0] sm:$0xff] (!%p195_p9) }
  0x18   : > { %s224_s9 = scalar_select %p223_p10, %s1242_s12, 31  ;;  %1033 = vmatpush3.bf16.msra.mxu1 %v984_v15  ;;  %985 = vmatpush3.bf16.msra.mxu0 %v984_v15  ;;  %v998_v36 = vpack.c.bf16 %v304_v33, %v303_v32  ;;  %v288_v38 = vld [vmem:[%s1494_s1 + $0x58] sm:$0xff]  ;;  %v306_v40 = vld [vmem:[%s1494_s1 + $0xe8] sm:$0xff]  ;;  %v289_v43 = vld [vmem:[%s1494_s1 + $0x60] sm:$0xff] }
  0x19   : > { %1026 = vmatprep.subr.bf16.mxu1 %v986_v16  ;;  %987 = vmatprep.subr.bf16.mxu0 %v986_v16  ;;  %v1000_v41 = vpack.c.bf16 %v288_v38, %v287_v37  ;;  %v1002_v42 = vpack.c.bf16 %v306_v40, %v305_v39  ;;  %v290_v44 = vld [vmem:[%s1494_s1 + $0x68] sm:$0xff]  ;;  %v307_v45 = vld [vmem:[%s1494_s1 + $0xf0] sm:$0xff]  ;;  %v308_v46 = vld [vmem:[%s1494_s1 + $0xf8] sm:$0xff] }
  0x1a   : > { %s1040_s15 = smul.u32 24, %s224_s9  ;;  %v1004_v47 = vpack.c.bf16 %v290_v44, %v289_v43  ;;  %v1006_v48 = vpack.c.bf16 %v308_v46, %v307_v45  ;;  %v291_v49 = vld [vmem:[%s1494_s1 + $0x70] sm:$0xff]  ;;  %v292_v50 = vld [vmem:[%s1494_s1 + $0x78] sm:$0xff]  ;;  %v309_v51 = vld [vmem:[%s1494_s1 + $0x100] sm:$0xff] }
  0x1b   : > { %v310_v52 = vld [vmem:[%s1494_s1 + $0x108] sm:$0xff]  ;;  %v1008_v53 = vpack.c.bf16 %v292_v50, %v291_v49  ;;  %v311_v56 = vld [vmem:[%s1494_s1 + $0x110] sm:$0xff]  ;;  %v312_v57 = vld [vmem:[%s1494_s1 + $0x118] sm:$0xff] }
  0x1c   : > { %s1282_s26 = scalar_lea.vmem %s1493_s0, %s1040_s15  ;;  %1034 = vmatpush3.bf16.msra.mxu1 %v988_v21  ;;  %989 = vmatpush3.bf16.msra.mxu0 %v988_v21  ;;  %v1010_v54 = vpack.c.bf16 %v310_v52, %v309_v51  ;;  %v707_v55 = vld [vmem:[%s1496_s3 + $0x8] sm:$0x3]  ;;  %v706_v58 = vld [vmem:[%s1496_s3] sm:$0xff]  ;;  %v1014_v62 = vpack.c.bf16 %v312_v57, %v311_v56  ;;  %vm1371_vm2 = vmpackc.low %vm364_vm0, %vm1153_vm1 }
  0x1d   : > { %v266_v27 = vld [vmem:[%s1282_s26 + $0x128] sm:$0xff]  ;;  %1027 = vmatprep.subr.bf16.mxu1 %v990_v22  ;;  %991 = vmatprep.subr.bf16.mxu0 %v990_v22  ;;  %v265_v59 = vld [vmem:[%s1282_s26 + $0x120] sm:$0xff]  ;;  %v268_v2 = vld [vmem:[%s1282_s26 + $0x138] sm:$0xff] }
  0x1e   : > { %492 = vmatprep.mubr.f32.mxu1 %v266_v27  ;;  %v230_v34 = vld [vmem:[%s1282_s26 + $0x8] sm:$0xff]  ;;  %715 = vperm.xlu1 %1083, %v707_v55   ;;  %v229_v60 = vld [vmem:[%s1282_s26] sm:$0xff]  ;;  %v232_v3 = vld [vmem:[%s1282_s26 + $0x18] sm:$0xff] }
  0x1f   : > { %432 = vmatprep.mubr.f32.mxu0 %v230_v34  ;;  %v269_v61 = vld [vmem:[%s1282_s26 + $0x140] sm:$0xff]  ;;  %v314_v0 = vld [vmem:[%s1494_s1 + $0x128] sm:$0xf]  ;;  %v272_v4 = vld [vmem:[%s1282_s26 + $0x158] sm:$0xff] }
  0x20   : > { %1035 = vmatpush3.bf16.msra.mxu1 %v992_v28  ;;  %993 = vmatpush3.bf16.msra.mxu0 %v992_v28  ;;  %v313_v63 = vld [vmem:[%s1494_s1 + $0x120] sm:$0xff]  ;;  %v236_v7 = vld [vmem:[%s1282_s26 + $0x38] sm:$0xff]  ;;  %v271_v8 = vld [vmem:[%s1282_s26 + $0x150] sm:$0xff] }
  0x21   : > { %1028 = vmatprep.subr.bf16.mxu1 %v994_v29  ;;  %995 = vmatprep.subr.bf16.mxu0 %v994_v29  ;;  %v233_v1 = vld [vmem:[%s1282_s26 + $0x20] sm:$0xff]  ;;  %v1018_v5 = vpack.c.bf16 %v314_v0, %v313_v63  ;;  %v235_v9 = vld [vmem:[%s1282_s26 + $0x30] sm:$0xff]  ;;  %v274_v12 = vld [vmem:[%s1282_s26 + $0x168] sm:$0xff] }
  0x22   : > { %710 = vperm.xlu1 %1083, %v706_v58   ;;  %v275_v10 = vld [vmem:[%s1282_s26 + $0x170] sm:$0xff]  ;;  %v238_v13 = vld [vmem:[%s1282_s26 + $0x48] sm:$0xff]  ;;  %v241_v17 = vld [vmem:[%s1282_s26 + $0x60] sm:$0xff] }
  0x23   : > { %v239_v11 = vld [vmem:[%s1282_s26 + $0x50] sm:$0xff]  ;;  %v242_v15 = vld [vmem:[%s1282_s26 + $0x68] sm:$0xff]  ;;  %v237_v18 = vld [vmem:[%s1282_s26 + $0x40] sm:$0xff] }
  0x24   : > { %1036 = vmatpush3.bf16.msra.mxu1 %v996_v35  ;;  %997 = vmatpush3.bf16.msra.mxu0 %v996_v35  ;;  %v231_v14 = vld [vmem:[%s1282_s26 + $0x10] sm:$0xff]  ;;  %v234_v16 = vld [vmem:[%s1282_s26 + $0x28] sm:$0xff]  ;;  %v245_v19 = vld [vmem:[%s1282_s26 + $0x80] sm:$0xff] }
  0x25   : > { %1029 = vmatprep.subr.bf16.mxu1 %v998_v36  ;;  %999 = vmatprep.subr.bf16.mxu0 %v998_v36  ;;  %v240_v20 = vld [vmem:[%s1282_s26 + $0x58] sm:$0xff]  ;;  %v243_v22 = vld [vmem:[%s1282_s26 + $0x70] sm:$0xff]  ;;  %v246_v24 = vld [vmem:[%s1282_s26 + $0x88] sm:$0xff] }
  0x26   : > { %v244_v21 = vld [vmem:[%s1282_s26 + $0x78] sm:$0xff]  ;;  %v247_v25 = vld [vmem:[%s1282_s26 + $0x90] sm:$0xff]  ;;  %v249_v26 = vld [vmem:[%s1282_s26 + $0xa0] sm:$0xff] }
  0x27   : > { %v248_v23 = vld [vmem:[%s1282_s26 + $0x98] sm:$0xff]  ;;  %v251_v27 = vld [vmem:[%s1282_s26 + $0xb0] sm:$0xff]  ;;  %v250_v29 = vld [vmem:[%s1282_s26 + $0xa8] sm:$0xff] }
  0x28   : > { %1037 = vmatpush3.bf16.msra.mxu1 %v1000_v41  ;;  %1001 = vmatpush3.bf16.msra.mxu0 %v1000_v41  ;;  %v252_v28 = vld [vmem:[%s1282_s26 + $0xb8] sm:$0xff]  ;;  %v255_v30 = vld [vmem:[%s1282_s26 + $0xd0] sm:$0xff]  ;;  %v254_v31 = vld [vmem:[%s1282_s26 + $0xc8] sm:$0xff] }
  0x29   : > { %1030 = vmatprep.subr.bf16.mxu1 %v1002_v42  ;;  %1003 = vmatprep.subr.bf16.mxu0 %v1002_v42  ;;  %v258_v32 = vld [vmem:[%s1282_s26 + $0xe8] sm:$0xff]  ;;  %v253_v33 = vld [vmem:[%s1282_s26 + $0xc0] sm:$0xff]  ;;  %v264_v36 = vld [vmem:[%s1282_s26 + $0x118] sm:$0xff] }
  0x2a   : > { %v261_v34 = vld [vmem:[%s1282_s26 + $0x100] sm:$0xff]  ;;  %v256_v37 = vld [vmem:[%s1282_s26 + $0xd8] sm:$0xff]  ;;  %v267_v38 = vld [vmem:[%s1282_s26 + $0x130] sm:$0xff] }
  0x2b   : > { %v257_v35 = vld [vmem:[%s1282_s26 + $0xe0] sm:$0xff]  ;;  %v260_v39 = vld [vmem:[%s1282_s26 + $0xf8] sm:$0xff]  ;;  %v270_v40 = vld [vmem:[%s1282_s26 + $0x148] sm:$0xff] }
  0x2c   : > { %1038 = vmatpush3.bf16.msra.mxu1 %v1004_v47  ;;  %1005 = vmatpush3.bf16.msra.mxu0 %v1004_v47  ;;  %v259_v41 = vld [vmem:[%s1282_s26 + $0xf0] sm:$0xff]  ;;  %v273_v42 = vld [vmem:[%s1282_s26 + $0x160] sm:$0xff]  ;;  %v276_v44 = vld [vmem:[%s1282_s26 + $0x178] sm:$0xff] }
  0x2d   : > { %1031 = vmatprep.subr.bf16.mxu1 %v1006_v48  ;;  %1007 = vmatprep.subr.bf16.mxu0 %v1006_v48  ;;  %v263_v43 = vld [vmem:[%s1282_s26 + $0x110] sm:$0xff]  ;;  %v262_v45 = vld [vmem:[%s1282_s26 + $0x108] sm:$0xff]  ;;  %v690_v47 = vld [vmem:[%s1495_s2] sm:$0xff]  ;;  %s220_s26 = sand.u32 1, %s1142_s21  }
  0x2e   : > { %v691_v46 = vld [vmem:[%s1495_s2 + $0x8] sm:$0x3]  ;;  %v729_v48 = vld [vmem:[#allocation2] sm:$0x1]  ;;  %s221_s14 = scalar_lea.vmem [#allocation3], %s220_s26  ;;  %s747_s19 = scalar_lea.sflag [#allocation4], %s220_s26 }
  0x2f   : > { %699 = vperm.xlu0 %1082, %v691_v46   ;;  %s759_s15 = sshll.u32 %s221_s14, 4  ;;  %s1453_s15 = int_to_ptr.vmem [resolvable:$true] %s759_s15 }
  0x30   : > { %1039 = vmatpush3.bf16.msra.mxu1 %v1008_v53  ;;  %1009 = vmatpush3.bf16.msra.mxu0 %v1008_v53  ;;  %s1088_s4 = scalar_lea.vmem %s1453_s15, 16  ;;  %p1095_p0 = scmp.lt.s32.totalorder %s1453_s15, %s1093_s27 }
  0x31   : > { %1011 = vmatprep.subr.bf16.mxu1 %v1010_v54  ;;  %p1089_p11 = scmp.ne.s32.totalorder %s1453_s15, %s1088_s4  ;;  %p1096_p1 = scmp.lt.s32.totalorder %s1094_s6, %s1088_s4 }
  0x33   : > { %493 = vmatmul.mubr.f32.vlgmr.msra.gmra.mrb[0].mxu1 %v265_v59  ;;  %433 = vmatmul.mubr.f32.vlgmr.msra.gmra.mrb[0].mxu0 %v229_v60  ;;  %p1090_p12 = pnand %p1089_p11, %p1223_p5  ;;  %p1097_p2 = por %p1096_p1, %p1095_p0 }
  0x34   : > { %1013 = vmatpush3.bf16.msra.mxu1 %v1010_v54  ;;  %497 = vmatprep.mubr.f32.mxu1 %v269_v61 }
  0x35   : > { %1015 = vmatprep.subr.bf16.mxu1 %v1014_v62  ;;  %437 = vmatprep.mubr.f32.mxu0 %v233_v1  ;;  %p1091_p13 = pneg %p1090_p12 }
  0x36   : > { %694 = vperm.xlu0 %1082, %v690_v47  }
  0x37   : > { %498 = vmatmul.mubr.f32.gmra.mrb[2].mxu1 %v268_v2  ;;  %438 = vmatmul.mubr.f32.gmra.mrb[2].mxu0 %v232_v3  ;;  %p1098_p3 = pnand %p1097_p2, %p1091_p13 }
  0x38   : > { %502 = vmatprep.mubr.f32.mxu1 %v272_v4  ;;  %1017 = vmatpush3.bf16.msra.mxu1 %v1014_v62 }
  0x39   : > { %1020 = vmatprep.subr.msk.bf16.mxu1 %vm1371_vm2, %v1018_v5  ;;  %442 = vmatprep.mubr.f32.mxu0 %v236_v7 }
  0x3a   : > { %732 = vperm.xlu0 %1082, %v729_v48  }
  0x3b   : > { %503 = vmatmul.mubr.f32.gmra.mrb[4].mxu1 %v271_v8  ;;  %443 = vmatmul.mubr.f32.gmra.mrb[4].mxu0 %v235_v9 }
  0x3c   : > { %507 = vmatprep.mubr.f32.mxu1 %v275_v10  ;;  %1023 = vmatpush3.bf16.msk.msra.mxu1 %vm1371_vm2, %v1018_v5 }
  0x3d   : > { %447 = vmatprep.mubr.f32.mxu0 %v239_v11 }
  0x3f   : > { %508 = vmatmul.mubr.f32.gmra.mrb[6].mxu1 %v274_v12  ;;  %448 = vmatmul.mubr.f32.gmra.mrb[6].mxu0 %v238_v13 }
  0x40   : > { %954 = vmatprep.mubr.msk.f32.mxu1 %vm315_vm3, %v231_v14  ;;  %452 = vmatprep.mubr.f32.mxu0 %v242_v15 }
  0x43   : > { %955 = vmatmul.mubr.msk.f32.vlgmr.msra.gmra.mrb[8].mxu1 %vm315_vm3, %v234_v16  ;;  %453 = vmatmul.mubr.f32.gmra.mrb[8].mxu0 %v241_v17 }
  0x44   : > { %957 = vmatprep.mubr.msk.f32.mxu1 %vm315_vm3, %v237_v18  ;;  %457 = vmatprep.mubr.f32.mxu0 %v245_v19 }
  0x47   : > { %958 = vmatmul.mubr.msk.f32.gmra.mrb[10].mxu1 %vm315_vm3, %v240_v20  ;;  %458 = vmatmul.mubr.f32.gmra.mrb[10].mxu0 %v244_v21 }
  0x48   : > { %960 = vmatprep.mubr.msk.f32.mxu1 %vm315_vm3, %v243_v22  ;;  %462 = vmatprep.mubr.f32.mxu0 %v248_v23 }
  0x4b   : > { %961 = vmatmul.mubr.msk.f32.gmra.mrb[12].mxu1 %vm315_vm3, %v246_v24  ;;  %463 = vmatmul.mubr.f32.gmra.mrb[12].mxu0 %v247_v25 }
  0x4c   : > { %963 = vmatprep.mubr.msk.f32.mxu1 %vm315_vm3, %v249_v26  ;;  %467 = vmatprep.mubr.f32.mxu0 %v251_v27 }
  0x4f   : > { %964 = vmatmul.mubr.msk.f32.gmra.mrb[14].mxu1 %vm315_vm3, %v252_v28  ;;  %468 = vmatmul.mubr.f32.gmra.mrb[14].mxu0 %v250_v29 }
  0x50   : > { %966 = vmatprep.mubr.msk.f32.mxu1 %vm315_vm3, %v255_v30  ;;  %472 = vmatprep.mubr.f32.mxu0 %v254_v31 }
  0x53   : > { %967 = vmatmul.mubr.msk.f32.gmra.mrb[16].mxu1 %vm315_vm3, %v258_v32  ;;  %473 = vmatmul.mubr.f32.gmra.mrb[16].mxu0 %v253_v33 }
  0x54   : > { %969 = vmatprep.mubr.msk.f32.mxu1 %vm315_vm3, %v261_v34  ;;  %477 = vmatprep.mubr.f32.mxu0 %v257_v35 }
  0x57   : > { %970 = vmatmul.mubr.msk.f32.gmra.mrb[18].mxu1 %vm315_vm3, %v264_v36  ;;  %478 = vmatmul.mubr.f32.gmra.mrb[18].mxu0 %v256_v37 }
  0x58   : > { %972 = vmatprep.mubr.msk.f32.mxu1 %vm315_vm3, %v267_v38  ;;  %482 = vmatprep.mubr.f32.mxu0 %v260_v39 }
  0x5b   : > { %973 = vmatmul.mubr.msk.f32.gmra.mrb[20].mxu1 %vm315_vm3, %v270_v40  ;;  %483 = vmatmul.mubr.f32.gmra.mrb[20].mxu0 %v259_v41 }
  0x5c   : > { %975 = vmatprep.mubr.msk.f32.mxu1 %vm315_vm3, %v273_v42  ;;  %487 = vmatprep.mubr.f32.mxu0 %v263_v43 }
  0x5f   : > { %976 = vmatmul.mubr.msk.f32.gmra.mrb[22].mxu1 %vm315_vm3, %v276_v44  ;;  %488 = vmatmul.mubr.f32.gmra.mrb[22].mxu0 %v262_v45 }
 0x106   : > { %v908_v49 = vpop.f32.mrb[0].mxu1  ;;  %v872_v50 = vpop.f32.mrb[0].mxu0 }
 0x107   : > { %v909_v51 = vpop.f32.mrb[1].mxu1  ;;  %v873_v52 = vpop.f32.mrb[1].mxu0 }
 0x108   : > { %v1440_v53 = vadd.f32 %v909_v51, %v908_v49  ;;  %v874_v54 = vadd.f32 %v873_v52, %v872_v50 }
 0x10a   : > { %v911_v55 = vpop.f32.mrb[2].mxu1  ;;  %v875_v56 = vpop.f32.mrb[2].mxu0 }
 0x10b   : > { %v912_v57 = vpop.f32.mrb[3].mxu1  ;;  %v876_v58 = vpop.f32.mrb[3].mxu0 }
 0x10c   : > { %v913_v59 = vadd.f32 %v912_v57, %v911_v55  ;;  %v877_v60 = vadd.f32 %v876_v58, %v875_v56 }
 0x10e   : > { %v914_v61 = vpop.f32.mrb[4].mxu1  ;;  %v878_v62 = vpop.f32.mrb[4].mxu0 }
 0x10f   : > { %v915_v63 = vpop.f32.mrb[5].mxu1  ;;  %v879_v0 = vpop.f32.mrb[5].mxu0 }
 0x110   : > { %v1442_v1 = vadd.f32 %v915_v63, %v914_v61  ;;  %v880_v2 = vadd.f32 %v879_v0, %v878_v62 }
 0x112   : > { %v917_v3 = vpop.f32.mrb[6].mxu1  ;;  %v881_v4 = vpop.f32.mrb[6].mxu0 }
 0x113   : > { %v918_v5 = vpop.f32.mrb[7].mxu1  ;;  %v882_v6 = vpop.f32.mrb[7].mxu0 }
 0x114   : > { %v919_v7 = vadd.f32 %v918_v5, %v917_v3  ;;  %v883_v8 = vadd.f32 %v882_v6, %v881_v4 }
 0x116   : > { %v956_v9 = vpop.f32.mrb[8].mxu1  ;;  %v884_v10 = vpop.f32.mrb[8].mxu0 }
 0x117   : > { %v585_v11 = vadd.f32 %v956_v9, %v877_v60  ;;  %v579_v12 = vpop.f32.mrb[9].mxu1  ;;  %v885_v13 = vpop.f32.mrb[9].mxu0 }
 0x118   : > { %v580_v14 = vadd.f32 %v874_v54, %v579_v12  ;;  %v886_v15 = vadd.f32 %v885_v13, %v884_v10 }
 0x11a   : > { %658 = vxpose.xlu1.b32.start [1/16] (narrow) %v580_v14, 16  ;;  %v959_v16 = vpop.f32.mrb[10].mxu1  ;;  %v887_v17 = vpop.f32.mrb[10].mxu0  ;;  %v735_v14 = vlaneseq }
 0x11b   : > { %v595_v18 = vadd.f32 %v959_v16, %v883_v8  ;;  %v589_v19 = vpop.f32.mrb[11].mxu1  ;;  %v888_v20 = vpop.f32.mrb[11].mxu0 }
 0x11c   : > { %v590_v21 = vadd.f32 %v880_v2, %v589_v19  ;;  %v889_v22 = vadd.f32 %v888_v20, %v887_v17  ;;  %v736_v17 = vshrl.u32 %v735_v14, 7 }
 0x11e   : > { %659 = vxpose.xlu1.b32.cont [2/16] (narrow) %v585_v11, 16  ;;  %v962_v23 = vpop.f32.mrb[12].mxu1  ;;  %v890_v24 = vpop.f32.mrb[12].mxu0  ;;  %v737_v20 = vsub.s32 0, %v736_v17 }
 0x11f   : > { %v605_v25 = vadd.f32 %v962_v23, %v889_v22  ;;  %v599_v26 = vpop.f32.mrb[13].mxu1  ;;  %v891_v27 = vpop.f32.mrb[13].mxu0 }
 0x120   : > { %v600_v28 = vadd.f32 %v886_v15, %v599_v26  ;;  %v892_v29 = vadd.f32 %v891_v27, %v890_v24 }
 0x122   : > { %660 = vxpose.xlu1.b32.cont [3/16] (narrow) %v590_v21, 16  ;;  %v965_v30 = vpop.f32.mrb[14].mxu1  ;;  %v893_v31 = vpop.f32.mrb[14].mxu0 }
 0x123   : > { %v609_v32 = vpop.f32.mrb[15].mxu1  ;;  %v894_v33 = vpop.f32.mrb[15].mxu0 }
 0x124   : > { %v610_v34 = vadd.f32 %v892_v29, %v609_v32  ;;  %v895_v35 = vadd.f32 %v894_v33, %v893_v31 }
 0x126   : > { %661 = vxpose.xlu1.b32.cont [4/16] (narrow) %v595_v18, 16  ;;  %v968_v36 = vpop.f32.mrb[16].mxu1  ;;  %v615_v37 = vadd.f32 %v965_v30, %v895_v35  ;;  %v896_v38 = vpop.f32.mrb[16].mxu0 }
 0x127   : > { %v619_v39 = vpop.f32.mrb[17].mxu1  ;;  %v897_v40 = vpop.f32.mrb[17].mxu0 }
 0x128   : > { %v898_v41 = vadd.f32 %v897_v40, %v896_v38 }
 0x12a   : > { %662 = vxpose.xlu1.b32.cont [5/16] (narrow) %v600_v28, 16  ;;  %v971_v42 = vpop.f32.mrb[18].mxu1  ;;  %v620_v43 = vadd.f32 %v898_v41, %v619_v39  ;;  %v899_v44 = vpop.f32.mrb[18].mxu0 }
 0x12b   : > { %v629_v45 = vpop.f32.mrb[19].mxu1  ;;  %v900_v46 = vpop.f32.mrb[19].mxu0 }
 0x12c   : > { %v901_v47 = vadd.f32 %v900_v46, %v899_v44 }
 0x12e   : > { %v974_v48 = vpop.f32.mrb[20].mxu1  ;;  %663 = vxpose.xlu1.b32.cont [6/16] (narrow) %v605_v25, 16  ;;  %v625_v49 = vadd.f32 %v968_v36, %v901_v47  ;;  %v902_v50 = vpop.f32.mrb[20].mxu0 }
 0x12f   : > { %v645_v51 = vadd.f32 %v974_v48, %v913_v59  ;;  %v639_v52 = vpop.f32.mrb[21].mxu1  ;;  %v903_v54 = vpop.f32.mrb[21].mxu0 }
 0x130   : > { %v640_v55 = vadd.f32 %v1440_v53, %v639_v52  ;;  %v904_v56 = vadd.f32 %v903_v54, %v902_v50  ;;  %v716_v53 = vpop.permute.xlu1 %715  ;;  %v700_v59 = vpop.permute.xlu0 %699 }
 0x132   : > { %v977_v57 = vpop.f32.mrb[22].mxu1  ;;  %664 = vxpose.xlu1.b32.cont [7/16] (narrow) %v610_v34, 16  ;;  %v630_v58 = vadd.f32 %v904_v56, %v629_v45  ;;  %v905_v60 = vpop.f32.mrb[22].mxu0 }
 0x133   : > { %v655_v61 = vadd.f32 %v977_v57, %v919_v7  ;;  %v649_v62 = vpop.f32.mrb[23].mxu1  ;;  %v906_v63 = vpop.f32.mrb[23].mxu0 }
 0x134   : > { %v650_v0 = vadd.f32 %v1442_v1, %v649_v62  ;;  %v907_v2 = vadd.f32 %v906_v63, %v905_v60  ;;  %v711_v4 = vpop.permute.xlu1 %710  ;;  %v695_v6 = vpop.permute.xlu0 %694 }
 0x136   : > { %665 = vxpose.xlu1.b32.cont [8/16] (narrow) %v615_v37, 16  ;;  %v635_v3 = vadd.f32 %v971_v42, %v907_v2 }
 0x138   : > { %v733_v22 = vpop.permute.xlu0 %732 }
 0x139   : > { %v738_v24 = vrot.slane %v733_v22, %v737_v20 }
 0x13a   : > { %666 = vxpose.xlu1.b32.cont [9/16] (narrow) %v620_v43, 16 }
 0x13e   : > { %667 = vxpose.xlu1.b32.cont [10/16] (narrow) %v625_v49, 16 }
 0x142   : > { %668 = vxpose.xlu1.b32.cont [11/16] (narrow) %v630_v58, 16 }
 0x146   : > { %669 = vxpose.xlu1.b32.cont [12/16] (narrow) %v635_v3, 16 }
 0x14a   : > { %670 = vxpose.xlu1.b32.cont [13/16] (narrow) %v640_v55, 16 }
 0x14e   : > { %671 = vxpose.xlu1.b32.cont [14/16] (narrow) %v645_v51, 16 }
 0x152   : > { %672 = vxpose.xlu1.b32.cont [15/16] (narrow) %v650_v0, 16 }
 0x156   : > { %673 = vxpose.xlu1.b32.end [16/16] (narrow) %v655_v61, 16 }
 0x19a   : > { %v674_v5 = vpop.trf.xlu1 }
 0x19b   : > { %v702_v7 = vadd.f32 %v695_v6, %v674_v5 }
 0x19d   : > { %v704_v1 = vmax.f32 %v702_v7, 0.0 }
 0x19e   : > { %v675_v8 = vpop.trf.xlu1 }
 0x19f   : > { %v703_v9 = vadd.f32 %v700_v59, %v675_v8  ;;  %v718_v12 = vmul.f32 %v711_v4, %v704_v1 }
 0x1a1   : > { %v705_v10 = vmax.f32 %v703_v9, 0.0 }
 0x1a3   : > { %v719_v11 = vmul.f32 %v716_v53, %v705_v10 }
 0x1a5   : > { %v721_v13 = vsel %vm720_vm4, %v719_v11, 0.0 }
 0x1a6   : > { %v722_v15 = vadd.f32 %v721_v13, %v718_v12 }
 0x1a8   : > { %v723_v16 = vrot.slane %v722_v15, 4 }
 0x1aa   : > { %v724_v18 = vadd.f32 %v723_v16, %v722_v15 }
 0x1ac   : > { %v725_v19 = vrot.slane %v724_v18, 2 }
 0x1ae   : > { %v726_v21 = vadd.f32 %v725_v19, %v724_v18 }
 0x1b0   : > { %v727_v23 = vrot.slane %v726_v21, 1 }
 0x1b2   : > { %v728_v25 = vadd.f32 %v727_v23, %v726_v21 }
 0x1b4   : > { %v739_v26 = vadd.f32 %v738_v24, %v728_v25 }
 0x1b6   : > { %v740_v27 = vsub.f32 0.0, %v739_v26 }
 0x1b8   : > { %v741_v28 = vmul.f32 1.442695, %v740_v27 }
 0x1ba   : > { %1084 = vpow2.f32 %v741_v28 }
 0x1c4   : > { %v1085_v29 = vpop.eup %1084 }
 0x1c5   : > { %v743_v30 = vadd.f32 1.0, %v1085_v29 }
 0x1c7   : > { %1086 = vrcp.f32 %v743_v30 }
 0x1d1   : > { %v1087_v31 = vpop.eup %1086 }
 0x1d2   : > { %745 = vst [vmem:[%s221_s14] sm:$0x1] %v1087_v31 }
 0x1d3   : > { %1101 = shalt.err (!%p1098_p3)
}
 0x1d4   : > { %s1102_s12 = scalar_lea.hbm %s1451_s18, 16  ;;  %s1106_s9 = scalar_lea.hbm %s1498_s5, 32 }
 0x1d5   : > { %p1103_p4 = scmp.ne.s32.totalorder %s1451_s18, %s1102_s12  ;;  %p1107_p9 = scmp.lt.u32.totalorder %s1451_s18, %s1498_s5 }
 0x1d6   : > { %p1108_p10 = scmp.lt.u32.totalorder %s1106_s9, %s1102_s12  ;;  %p1110_p12 = scmp.lt.u32.totalorder %s1102_s12, %s1451_s18 }
 0x1d7   : > { %p1104_p7 = pnand %p1103_p4, %p1223_p5 }
 0x1d8   : > { %p1109_p11 = por %p1108_p10, %p1107_p9 }
 0x1d9   : > { %p1105_p8 = pneg %p1104_p7 }
 0x1da   : > { %p1111_p13 = por %p1110_p12, %p1109_p11 }
 0x1dc   : > { %p1112_p0 = pnand %p1111_p13, %p1105_p8 }
 0x1de   : > { %1115 = shalt.err (!%p1112_p0)
}
 0x1df   : > { %1041 = dma.vmem_to_hbm [thread:$0]  (%p1223_p5), %s1453_s15, 16, %s1451_s18, %s747_s19  }
 0x1e0 PF: > { %p1047_p1 = scmp.ge.s32.totalorder %s1150_s23, 2  ;;  %s771_s13 = sand.u32 1, %s1138_s20  }
 0x1e1   : > { %s772_s26 = scalar_lea.sflag [#allocation4], %s771_s13 }
 0x1e2   : > { %p1044_p2 = pnand %p1047_p1, %p1227_p6 }
 0x1e4   : > { %1133 = dma.done.wait (!%p1044_p2), %s772_s26, 16  }
 0x1e5   : > { %1135 = vsyncadd (!%p1044_p2), %s772_s26, 4294967280  ;;  %p17_p3 = scmp.ge.s32.totalorder %s1211_s25, 4   ;;  %s1503_s20 = smov %s1142_s21 }
 0x1e6   : > { %s1504_s21 = smov %s1146_s22  ;;  %s1505_s22 = smov %s1221_s28 }
 0x1e7   : > { %s1506_s23 = smov %s1211_s25  ;;  %19 = sbr.rel (!%p17_p3) target bundleno = 6 (0x6), region = 75 }
 0x1ee   :  { %776 = vsyncpa [#allocation4], 1 }
 0x1ef   :  { %778 = vsyncpa [#allocation4 + $0x1], 1 }

</bundles_post_ra>
